<compile_context>
chip_gen: v7x
topology: tpu7x:2x2x1
jax: 0.10.0
libtpu: 0.0.40
codegen_flags: <defaults>
</compile_context>

<pallas_src>
import functools

import numpy as np

import jax
import jax.numpy as jnp
from jax.experimental import pallas as pl
from jax.experimental.pallas import tpu as pltpu


# ----------------------------------------------------------------------------
# pltpu.roll direction probe (one tiny kernel, cached).  Makes the im2col shift
# direction robust across JAX/Mosaic versions; +1 == pltpu.roll follows jnp.roll.
# Resolved eagerly from __main__ (outside any trace) so it is not a surprising
# trace-time side effect.
# ----------------------------------------------------------------------------
def _roll_probe_kernel(x_ref, o_ref):
    o_ref[...] = pltpu.roll(x_ref[...], 1, axis=1)


_ROLL_SIGN = None


def _pltpu_roll_sign():
    global _ROLL_SIGN
    if _ROLL_SIGN is None:
        x = jnp.arange(8 * 256, dtype=jnp.float32).reshape(8, 256)
        rolled = pl.pallas_call(
            _roll_probe_kernel,
            out_shape=jax.ShapeDtypeStruct((8, 256), jnp.float32),
        )(x)
        _ROLL_SIGN = 1 if bool(jnp.array_equal(rolled, jnp.roll(x, 1, axis=1))) else -1
    return _ROLL_SIGN


def _physical_vmem_bytes():
    """Per-core physical VMEM; conservative (v7x) fallback if the query fails."""
    try:
        info = pltpu.get_tpu_info()
        for attr in ("vmem_capacity_bytes", "vmem_size_bytes", "vmem_bytes"):
            v = getattr(info, attr, None)
            if v:
                return int(v)
    except Exception:
        pass
    return 64 * 2 ** 20


# ----------------------------------------------------------------------------
# Kernel: one grid step processes B_TILE images folded into the lane axis.
# ----------------------------------------------------------------------------
def _head_kernel(x_ref, w1t_ref, mask_ref, shift_ref, w2t_ref, b2_ref, o_ref,
                 col_ref, *, H, W, roll_sign):
    """
    x_ref    : (C_in,   B*HW)   f32   input slab (channel rows, lane-dense spatial)
    w1t_ref  : (C_mid,  9*C_in) bf16  conv1 weights with BN scale folded, K=(ky,kx,cin)
    mask_ref : (9,      B*HW)   f32   1/0 border masks per 3x3 tap (tiled per image)
    shift_ref: (C_mid,  1)      f32   folded BN shift (includes conv1 bias)
    w2t_ref  : (C_out,  C_mid)  bf16  conv2 (1x1) weights, transposed
    b2_ref   : (C_out,  1)      f32   conv2 bias
    o_ref    : (C_out,  B*HW)   f32   output slab (NCHW once unfolded)
    col_ref  : (9*C_in, B*HW)   f32   VMEM im2col scratch
    """
    lanes = x_ref.shape[1]                      # B_TILE * H * W
    c_in = x_ref.shape[0]
    mm_dtype = w1t_ref.dtype                    # matmul operand dtype (bf16 or f32)
    xf = x_ref[...]

    # im2col: row block t = 3*ky + kx holds the input shifted by tap offset
    # (ky-1, kx-1).  The shift is a lane rotation (XLU slot, otherwise idle); the
    # precomputed mask zeroes positions whose source sits in the conv's zero-padding
    # halo.  Valid (mask==1) positions never shift across an image boundary, so one
    # roll over the whole B_TILE*HW lane axis is exact for the batched slab.
    for t in range(9):
        ky, kx = divmod(t, 3)
        src_off = (ky - 1) * W + (kx - 1)
        if t == 4:                              # centre tap: no shift, all-ones mask
            col_ref[t * c_in:(t + 1) * c_in, :] = xf
            continue
        shift = (roll_sign * (-src_off)) % lanes
        shifted = pltpu.roll(xf, shift, axis=1)
        col_ref[t * c_in:(t + 1) * c_in, :] = shifted * mask_ref[t:t + 1, :]

    # conv1 (3x3) as ONE fused K = 9*C_in matmul, bf16 operands / f32 accumulation.
    y = jnp.dot(w1t_ref[...], col_ref[...].astype(mm_dtype),
                preferred_element_type=jnp.float32)
    # Folded BN shift (+ conv1 bias) and ReLU; scale already lives in w1t.  (f32)
    y = jnp.maximum(y + shift_ref[...], 0.0)

    # conv2 (1x1) == channel matmul + bias; lane-dense stores (last dim % 256 == 0).
    out = jnp.dot(w2t_ref[...], y.astype(mm_dtype),
                  preferred_element_type=jnp.float32)
    o_ref[...] = (out + b2_ref[...]).astype(o_ref.dtype)


def single_layer_head_forward(x_nchw, params, *, num_anchors, num_class,
                              last_channel, b_tile=None,
                              matmul_dtype=jnp.bfloat16):
    """Pallas implementation of singleLayerHead.forward (eval-mode BN)."""
    N, C_in, H, W = map(int, x_nchw.shape)
    HW = H * W
    w1, b1, gamma, beta, run_mean, run_var, w2, b2 = params
    C_mid = int(w1.shape[-1])
    C_out = int(w2.shape[-1])
    eps = 1e-5

    phys_vmem = _physical_vmem_bytes()

    # ---- batch tile selection --------------------------------------------------
    if b_tile is None:
        per_img = 4 * HW * (2 * C_in + 2 * C_out + 9 * C_in + 2 * C_mid)
        cap = max(1, (phys_vmem // 3) // max(per_img, 1))
        b_tile = min(N, cap)
        if N >= 2:                       # keep >= 2 grid steps for v7x's 2 TCs
            b_tile = min(b_tile, (N + 1) // 2)
    b_tile = max(1, min(int(b_tile), N))
    if (b_tile * HW) % 128 != 0:         # keep the lane-dim block 128-aligned
        b_tile = N                        # fall back to one full-extent block
    n_steps = -(-N // b_tile)
    N_pad = n_steps * b_tile
    BHW = b_tile * HW

    # ---- fold BN (running stats) + conv1 bias into weights / shift -------------
    #   bn(conv1(x)) = (W1 * scale) (*) x + shift,  shift = beta + (b1 - mean)*scale
    scale = gamma / jnp.sqrt(run_var + eps)                      # (C_mid,)
    shift = beta + (b1 - run_mean) * scale                       # (C_mid,)

    # conv1 weights (3,3,C_in,C_mid) -> (C_mid, 9*C_in) with BN scale folded in; the
    # K order (ky, kx, c_in) matches the im2col rows built inside the kernel.
    w1t = jnp.transpose((w1 * scale).reshape(9 * C_in, C_mid)).astype(matmul_dtype)
    w2t = jnp.transpose(w2).astype(matmul_dtype)                 # (C_out, C_mid)

    # ---- 1/0 validity masks for the 9 taps of the 3x3 / pad=1 conv --------------
    p = np.arange(HW)
    ii, jj = p // W, p % W
    masks = []
    for ky in range(3):
        for kx in range(3):
            valid = ((ii + ky - 1 >= 0) & (ii + ky - 1 < H)
                     & (jj + kx - 1 >= 0) & (jj + kx - 1 < W))
            masks.append(valid)
    mask = np.tile(np.stack(masks).astype(np.float32), (1, b_tile))   # (9, BHW)
    mask = jnp.asarray(mask)

    # ---- channels-major, lane-dense input slab ----------------------------------
    # (N,C,H,W) -> (C, N*HW): one small XLA transpose so B_TILE images fold into the
    # 128-lane axis (matmul N dim = B_TILE*HW, a multiple of 256 for v6e/v7x MXU).
    x = x_nchw.reshape(N, C_in, HW).astype(jnp.float32).transpose(1, 0, 2)
    if N_pad != N:
        x = jnp.pad(x, ((0, 0), (0, N_pad - N), (0, 0)))
    x = x.reshape(C_in, N_pad * HW)

    # ---- VMEM budget from the working set, clamped to the chip's physical VMEM --
    mm_bytes = jnp.dtype(matmul_dtype).itemsize
    need = 4 * 2 * (C_in + C_out) * BHW                    # double-buffered I/O blocks
    need += 2 * (mm_bytes * (C_mid * 9 * C_in + C_out * C_mid)
                 + 4 * (9 * BHW + C_mid + C_out))          # resident constant inputs
    need += 4 * 9 * C_in * BHW                             # im2col scratch (f32)
    need += 4 * (9 * C_in + 2 * C_mid + C_out) * BHW       # live intermediates headroom
    vmem_limit = int(min(int(0.75 * phys_vmem), max(16 * 2 ** 20, 2 * need)))

    flops = int(2 * (9 * C_in * C_mid + C_mid * C_out) * HW * N_pad)
    bytes_accessed = int(x.size * 4 + N_pad * C_out * HW * 4 + mask.size * 4
                         + w1t.size * mm_bytes + w2t.size * mm_bytes
                         + (C_mid + C_out) * 4)

    out2d = pl.pallas_call(
        functools.partial(_head_kernel, H=H, W=W, roll_sign=_pltpu_roll_sign()),
        out_shape=jax.ShapeDtypeStruct((C_out, N_pad * HW), jnp.float32),
        grid=(n_steps,),
        in_specs=[
            pl.BlockSpec((C_in, BHW), lambda n: (0, n)),
            # Constant-index operands below are re-used across the whole grid.
            pl.BlockSpec((C_mid, 9 * C_in), lambda n: (0, 0)),
            pl.BlockSpec((9, BHW), lambda n: (0, 0)),
            pl.BlockSpec((C_mid, 1), lambda n: (0, 0)),
            pl.BlockSpec((C_out, C_mid), lambda n: (0, 0)),
            pl.BlockSpec((C_out, 1), lambda n: (0, 0)),
        ],
        out_specs=pl.BlockSpec((C_out, BHW), lambda n: (0, n)),
        scratch_shapes=[pltpu.VMEM((9 * C_in, BHW), jnp.float32)],
        compiler_params=pltpu.CompilerParams(
            dimension_semantics=("parallel",),
            vmem_limit_bytes=vmem_limit),
        cost_estimate=pl.CostEstimate(flops=flops, transcendentals=0,
                                      bytes_accessed=bytes_accessed),
    )(x, w1t, mask, shift[:, None].astype(jnp.float32),
      w2t, b2[:, None].astype(jnp.float32))

    # (C_out, N_pad*HW) -> NCHW -> the .view(...) equivalent of the module.
    out = out2d.reshape(C_out, N_pad, HW).transpose(1, 0, 2)[:N]
    out = out.reshape(N, C_out, H, W)
    A = num_anchors * (num_class + 7)
    return out.reshape(-1, last_channel, A, H, W)


def _reference_forward(x_nchw, params):
    """Pure-JAX reference (lax conv) for a correctness check."""
    w1, b1, gamma, beta, run_mean, run_var, w2, b2 = params
    eps = 1e-5
    y = jax.lax.conv_general_dilated(
        x_nchw, w1, window_strides=(1, 1), padding=((1, 1), (1, 1)),
        dimension_numbers=("NCHW", "HWIO", "NCHW"))
    y = y + b1[None, :, None, None]
    y = gamma[None, :, None, None] * (y - run_mean[None, :, None, None]) \
        / jnp.sqrt(run_var[None, :, None, None] + eps) + beta[None, :, None, None]
    y = jnp.maximum(y, 0.0)
    z = jax.lax.conv_general_dilated(
        y, w2[None, None, :, :], window_strides=(1, 1), padding="VALID",
        dimension_numbers=("NCHW", "HWIO", "NCHW"))
    return z + b2[None, :, None, None]


if __name__ == "__main__":
    # Small, module-consistent configuration: in_feature_size = [N, C, H, W].
    num_anchors, num_class, last_channel = 3, 2, 1
    N, C_in, H, W = 2, 4, 16, 16
    C_mid = C_in * 2
    C_out = int(last_channel * num_anchors * (num_class + 7))   # 27

    key = jax.random.PRNGKey(0)
    k = jax.random.split(key, 9)
    # Deterministic synthetic parameters (PyTorch layers noted; conv weights in HWIO).
    w1 = 0.1 * jax.random.normal(k[0], (3, 3, C_in, C_mid), jnp.float32)   # conv1.weight
    b1 = 0.1 * jax.random.normal(k[1], (C_mid,), jnp.float32)              # conv1.bias
    gamma = 1.0 + 0.1 * jax.random.normal(k[2], (C_mid,), jnp.float32)     # bn1.weight
    beta = 0.1 * jax.random.normal(k[3], (C_mid,), jnp.float32)            # bn1.bias
    run_mean = 0.1 * jax.random.normal(k[4], (C_mid,), jnp.float32)        # bn1.running_mean
    run_var = 1.0 + 0.1 * jax.random.uniform(k[5], (C_mid,), jnp.float32)  # bn1.running_var
    w2 = 0.1 * jax.random.normal(k[6], (C_mid, C_out), jnp.float32)        # conv2.weight
    b2 = 0.1 * jax.random.normal(k[7], (C_out,), jnp.float32)              # conv2.bias
    params = (w1, b1, gamma, beta, run_mean, run_var, w2, b2)

    x = jax.random.normal(k[8], (N, C_in, H, W), jnp.float32)

    _pltpu_roll_sign()          # resolve the roll convention once, outside any trace

    expected_shape = (N, last_channel, num_anchors * (num_class + 7), H, W)
    ref = _reference_forward(x, params).reshape(expected_shape)

    # Default config: bf16 matmul operands, auto batch tile (keeps 2 grid steps).
    out_bf16 = single_layer_head_forward(
        x, params, num_anchors=num_anchors, num_class=num_class,
        last_channel=last_channel)
    out_bf16 = jax.block_until_ready(out_bf16)
    assert out_bf16.shape == expected_shape, (out_bf16.shape, expected_shape)
    err_bf16 = float(jnp.max(jnp.abs(out_bf16 - ref)))
    assert err_bf16 < 6e-2, err_bf16          # bf16 operands, f32 accumulation

    # Batched lane-fold path: both images in one grid step (B_TILE = 2).
    out_b2 = jax.block_until_ready(single_layer_head_forward(
        x, params, num_anchors=num_anchors, num_class=num_class,
        last_channel=last_channel, b_tile=2))
    assert out_b2.shape == expected_shape
    assert float(jnp.max(jnp.abs(out_b2 - out_bf16))) < 1e-4

    # f32 matmul path: tight check of the kernel math against the lax.conv reference.
    out_f32 = jax.block_until_ready(single_layer_head_forward(
        x, params, num_anchors=num_anchors, num_class=num_class,
        last_channel=last_channel, b_tile=2, matmul_dtype=jnp.float32))
    err_f32 = float(jnp.max(jnp.abs(out_f32 - ref)))
    assert err_f32 < 5e-4, err_f32

    print("KERNEL_OK")
</pallas_src>

<mosaic_0001>
module attributes {stable_mosaic.version = 11 : i64} {
  func.func @_roll_probe_kernel(%arg0: memref<8x256xf32, #tpu.memory_space<vmem>>, %arg1: memref<8x256xf32, #tpu.memory_space<vmem>>) attributes {dimension_semantics = [], scalar_prefetch = 0 : i64, scratch_operands = 0 : i64, tpu.core_type = #tpu.core_type<tc>} {
    %c0 = arith.constant 0 : index
    %c0_0 = arith.constant 0 : index
    %0 = vector.load %arg0[%c0, %c0_0] : memref<8x256xf32, #tpu.memory_space<vmem>>, vector<8x256xf32>
    %c1_i32 = arith.constant 1 : i32
    %1 = tpu.dynamic_rotate %0 by %c1_i32 dim 1 : vector<8x256xf32>, i32 -> vector<8x256xf32>
    %c0_1 = arith.constant 0 : index
    %c0_2 = arith.constant 0 : index
    %2 = vector.load %arg1[%c0_1, %c0_2] : memref<8x256xf32, #tpu.memory_space<vmem>>, vector<8x256xf32>
    tpu.vector_store %arg1[%c0_1, %c0_2], %1 {strides = array<i32>} : memref<8x256xf32, #tpu.memory_space<vmem>>, vector<8x256xf32>,
    return
  }
}

</mosaic_0001>

<bundles_post_ra>
// kernel: tpu_custom_call.1
= control target key start
LH: loop header
LB: loop body
LE: loop exit
PB: predicated region body
PF: predicated region fallthrough
CT: control target
= control target key end

     0   :  { %6 = vsyncpa [#allocation3], 0  ;;  %s137_s0 = inlined_call_operand.hbm [shape: f32[8,256], index: 0, kind: input, shape index: {}]   ;;  %s138_s1 = inlined_call_operand.hbm [shape: f32[8,256], index: 1, kind: output, shape index: {}]  }
   0x1   :  { %7 = vsyncpa [#allocation4], 0  ;;  %s100_s6 = smov [#allocation2]   ;;  %s52_s10 = scalar_lea.hbm %s137_s0, 256 }
   0x2   :  { %s14_s7 = sshll.u32 %s100_s6, 4  ;;  %p53_p0 = scmp.ne.s32.totalorder %s137_s0, %s52_s10  ;;  %s15_s7 = int_to_ptr.vmem [resolvable:$true] %s14_s7 }
   0x3   :  { %p56_p1 = scmp.lt.u32.totalorder %s52_s10, %s137_s0 }
   0x5   :  { %p58_p2 = pnand %p56_p1, %p53_p0 }
   0x7   :  { %61 = shalt.err (!%p58_p2)
}
   0x8   :  { %s62_s15 = scalar_lea.vmem %s15_s7, 256  ;;  %p67_p4 = scmp.lt.s32.totalorder %s15_s7, %s15_s7 }
   0x9   :  { %p63_p3 = scmp.ne.s32.totalorder %s15_s7, %s62_s15  ;;  %p68_p5 = scmp.lt.s32.totalorder %s62_s15, %s62_s15 }
   0xb   :  { %p69_p6 = por %p68_p5, %p67_p4 }
   0xd   :  { %p70_p7 = pnand %p69_p6, %p63_p3 }
   0xf   :  { %73 = shalt.err (!%p70_p7)
}
  0x10   :  { %17 = dma.hbm_to_vmem [thread:$0]  %s137_s0, 256, %s15_s7, [#allocation3]  }
  0x11   :  { %96 = dma.done.wait [#allocation3], 256  }
  0x12   :  { %97 = vsyncadd [#allocation3], 4294967040  ;;  %v21_v0 = vld [vmem:[#allocation2] sm:$0xff]  ;;  %s101_s18 = smov 1   ;;  %v22_v1 = vld [vmem:[#allocation2 + $0x8] sm:$0xff]  ;;  %v27_v2 = vlaneseq  ;;  %s102_s19 = smov [#allocation5]  }
  0x13   :  { %23 = vrot.lane.b32.xlu0 %v21_v0, %s101_s18  ;;  %s40_s20 = sshll.u32 %s102_s19, 4  ;;  %s41_s20 = int_to_ptr.vmem [resolvable:$true] %s40_s20 }
  0x14   :  { %v28_v3 = vand.u32 127, %v27_v2  ;;  %s74_s0 = scalar_lea.vmem %s41_s20, 256  ;;  %p79_p9 = scmp.lt.s32.totalorder %s41_s20, %s41_s20 }
  0x15   :  { %p75_p8 = scmp.ne.s32.totalorder %s41_s20, %s74_s0  ;;  %p80_p10 = scmp.lt.s32.totalorder %s74_s0, %s74_s0 }
  0x16   :  { %vm29_vm0 = vcmp.lt.s32.totalorder %v28_v3, 1 }
  0x17   :  { %25 = vrot.lane.b32.xlu0 %v22_v1, %s101_s18  ;;  %p81_p11 = por %p80_p10, %p79_p9 }
  0x19   :  { %p82_p12 = pnand %p81_p11, %p75_p8 }
  0x85   :  { %v24_v4 = vpop.permute.xlu0 %23 }
  0x89   :  { %v26_v5 = vpop.permute.xlu0 %25 }
  0x8a   :  { %v30_v6 = vsel %vm29_vm0, %v24_v4, %v26_v5  ;;  %v31_v7 = vsel %vm29_vm0, %v26_v5, %v24_v4 }
  0x8b   :  { %32 = vst [vmem:[#allocation5] sm:$0xff] %v31_v7  ;;  %33 = vst [vmem:[#allocation5 + $0x8] sm:$0xff] %v30_v6 }
  0x8c   :  { %85 = shalt.err (!%p82_p12)
}
  0x8d   :  { %s86_s23 = scalar_lea.hbm %s138_s1, 256 }
  0x8e   :  { %p87_p13 = scmp.ne.s32.totalorder %s138_s1, %s86_s23  ;;  %p90_p0 = scmp.lt.u32.totalorder %s86_s23, %s138_s1 }
  0x90   :  { %p92_p1 = pnand %p90_p0, %p87_p13 }
  0x92   :  { %95 = shalt.err (!%p92_p1)
}
  0x93   :  { %43 = dma.vmem_to_hbm [thread:$0]  %s41_s20, 256, %s138_s1, [#allocation4]  }
  0x94   :  { %98 = dma.done.wait [#allocation4], 256  }
  0x95   :  { %99 = vsyncadd [#allocation4], 4294967040 }
  0x96   :  { %47 = vsyncpa [#allocation3], 1 }
  0x97   :  { %48 = vsyncpa [#allocation4], 1 }

</bundles_post_ra>
